<compile_context>
chip_gen: v6e
topology: v6e:2x2x1
jax: 0.10.0
libtpu: 0.0.40
codegen_flags: <defaults>
</compile_context>

<pallas_src>
import jax
import jax.numpy as jnp
from jax.experimental import pallas as pl
from jax.experimental.pallas import tpu as pltpu


def _cdiv(a, b):
    return (a + b - 1) // b


def _pick_tile_blocks(n_blocks, cap_blocks):
    """Largest divisor of n_blocks that is <= cap_blocks, preferring >=2 grid steps."""
    if n_blocks <= 1:
        return 1
    limit = max(1, min(cap_blocks, n_blocks // 2))   # >=2 steps when possible (v7x)
    best = 1
    for d in range(1, limit + 1):
        if n_blocks % d == 0:
            best = d
    return best


def _make_kernel(ind, outd):
    def kernel(x_ref, w1t_ref, b1_ref, w2t_ref, b2_ref, w3_ref, b3_ref, o_ref):
        x = x_ref[...]            # (ind, TB) f32, batch on lanes
        w1t = w1t_ref[...]        # (w,  ind) f32

        # fc1: K = ind is tiny -> VPU broadcast-FMAs (outer products), skip the MXU.
        # b1 folded into the accumulator init: removes one full (w, TB) add pass.
        h1 = b1_ref[...] + w1t[:, 0:1] * x[0:1, :]          # (w,1)+(w,1)*(1,TB)
        for k in range(1, ind):
            h1 = h1 + w1t[:, k:k + 1] * x[k:k + 1, :]
        h1 = jnp.maximum(h1, 0.0)                           # (w, TB) f32

        # fc2: 64 x 64 x TB -> the only matmul worth the MXU.  bf16 operands hit the
        # native MXU rate on every generation; accumulate in f32.
        h2 = jnp.dot(w2t_ref[...], h1.astype(jnp.bfloat16),
                     preferred_element_type=jnp.float32)
        h2 = jnp.maximum(h2 + b2_ref[...], 0.0)             # (w2, TB) f32

        # fc3:
        if outd == 1:
            # M=1 matmul is degenerate for the MXU -> VPU multiply + sublane reduce.
            z = jnp.sum(w3_ref[...] * h2, axis=0, keepdims=True) + b3_ref[...]  # (1, TB)
        else:
            z = jnp.dot(w3_ref[...], h2, preferred_element_type=jnp.float32) + b3_ref[...]

        # Sigmoid via a single EUP tanh (robust for very negative/positive z).
        o_ref[...] = 0.5 * (1.0 + jnp.tanh(0.5 * z))        # (outd, TB)

    return kernel


def mlp_forward(x, w1, b1, w2, b2, w3, b3, *, tb=8192):
    """x: (B, ind); w*: (in_features, out_features); b*: (out_features,)."""
    B, ind = x.shape
    w = w1.shape[1]
    w2d = w2.shape[1]
    outd = w3.shape[1]

    # Pad batch only to a multiple of 128 (waste < 128 rows), then choose the largest
    # lane tile (multiple of 128, <= tb) that divides the padded batch exactly.
    n_blocks = _cdiv(B, 128)
    Bp = n_blocks * 128
    d = _pick_tile_blocks(n_blocks, max(1, tb // 128))
    tb_eff = 128 * d
    grid = (n_blocks // d,)

    # One-time wrapper-side layout plumbing (feature-major, batch on lanes).
    # Transpose first, then pad along the lane axis so XLA emits a single copy.
    x_t = jnp.pad(x.astype(jnp.float32).T, ((0, 0), (0, Bp - B)))   # (ind, Bp)
    w1t = w1.astype(jnp.float32).T                                  # (w, ind)
    b1c = b1.astype(jnp.float32).reshape(w, 1)
    w2t = w2.T.astype(jnp.bfloat16)                                 # (w2, w)  bf16 MXU operand
    b2c = b2.astype(jnp.float32).reshape(w2d, 1)
    if outd == 1:
        w3k = w3.astype(jnp.float32).reshape(w2d, 1)                # (w2, 1) column
    else:
        w3k = w3.astype(jnp.float32).T                              # (outd, w2)
    b3c = b3.astype(jnp.float32).reshape(outd, 1)

    # Weights/biases: constant index_map -> VMEM-resident across all grid steps.
    const = lambda shape: pl.BlockSpec(shape, lambda i: (0, 0))

    out_t = pl.pallas_call(
        _make_kernel(ind, outd),
        out_shape=jax.ShapeDtypeStruct((outd, Bp), jnp.float32),
        grid=grid,
        in_specs=[
            pl.BlockSpec((ind, tb_eff), lambda i: (0, i)),   # x tile marches over batch
            const(w1t.shape), const(b1c.shape),
            const(w2t.shape), const(b2c.shape),
            const(w3k.shape), const(b3c.shape),
        ],
        out_specs=pl.BlockSpec((outd, tb_eff), lambda i: (0, i)),
        compiler_params=pltpu.CompilerParams(
            dimension_semantics=("parallel",),
        ),
    )(x_t, w1t, b1c, w2t, b2c, w3k, b3c)

    return out_t.T[:B]                                              # (B, outd)


def init_params(key, ind=2, w=64, w2=64, outd=1):
    # Deterministic init mimicking nn.Linear's U(-1/sqrt(fan_in), 1/sqrt(fan_in)).
    ks = jax.random.split(key, 6)

    def lin(kw, kb, fan_in, fan_out):
        bound = 1.0 / jnp.sqrt(fan_in)
        W = jax.random.uniform(kw, (fan_in, fan_out), jnp.float32, -bound, bound)
        b = jax.random.uniform(kb, (fan_out,), jnp.float32, -bound, bound)
        return W, b

    W1, b1 = lin(ks[0], ks[1], ind, w)
    W2, b2 = lin(ks[2], ks[3], w, w2)
    W3, b3 = lin(ks[4], ks[5], w2, outd)
    return W1, b1, W2, b2, W3, b3


def _reference(x, W1, b1, W2, b2, W3, b3):
    h = jnp.maximum(x @ W1 + b1, 0.0)
    h = jnp.maximum(h @ W2 + b2, 0.0)
    return jax.nn.sigmoid(h @ W3 + b3)


if __name__ == "__main__":
    key = jax.random.PRNGKey(0)
    k_x1, k_x2, k_x3, k_p = jax.random.split(key, 4)

    ind, w, w2, outd = 2, 64, 64, 1
    W1, b1, W2, b2, W3, b3 = init_params(k_p, ind=ind, w=w, w2=w2, outd=outd)

    # Tolerance accounts for bf16 MXU operands (f32 accumulation keeps it tight).
    ATOL = RTOL = 2e-3

    # Main run: multi-step, double-buffered grid (B=512 -> 2 steps of 256 lanes).
    B1 = 512
    x1 = jax.random.normal(k_x1, (B1, ind), jnp.float32)
    out1 = mlp_forward(x1, W1, b1, W2, b2, W3, b3)
    jax.block_until_ready(out1)
    ref1 = _reference(x1, W1, b1, W2, b2, W3, b3)
    assert out1.shape == (B1, outd)
    assert jnp.allclose(out1, ref1, atol=ATOL, rtol=RTOL)

    # Ragged-batch run: B not a multiple of 128 -> pads to 384, grid of 3 x 128-lane tiles.
    B2 = 300
    x2 = jax.random.normal(k_x2, (B2, ind), jnp.float32)
    out2 = mlp_forward(x2, W1, b1, W2, b2, W3, b3)
    jax.block_until_ready(out2)
    ref2 = _reference(x2, W1, b1, W2, b2, W3, b3)
    assert out2.shape == (B2, outd)
    assert jnp.allclose(out2, ref2, atol=ATOL, rtol=RTOL)

    # Tiny-batch run: pads to one 128-lane tile, single grid step.
    B3 = 8
    x3 = jax.random.normal(k_x3, (B3, ind), jnp.float32)
    out3 = mlp_forward(x3, W1, b1, W2, b2, W3, b3)
    jax.block_until_ready(out3)
    ref3 = _reference(x3, W1, b1, W2, b2, W3, b3)
    assert out3.shape == (B3, outd)
    assert jnp.allclose(out3, ref3, atol=ATOL, rtol=RTOL)

    # TODO(synk): BCELoss / SGD training step (`train`) is host-side optimizer glue,
    # not part of the forward hot path, so it is intentionally not kernelized.
    print("KERNEL_OK")
</pallas_src>

<mosaic_0001>
module attributes {stable_mosaic.version = 11 : i64} {
  func.func @kernel(%arg0: i32, %arg1: memref<2x256xf32, #tpu.memory_space<vmem>>, %arg2: memref<64x2xf32, #tpu.memory_space<vmem>>, %arg3: memref<64x1xf32, #tpu.memory_space<vmem>>, %arg4: memref<64x64xbf16, #tpu.memory_space<vmem>>, %arg5: memref<64x1xf32, #tpu.memory_space<vmem>>, %arg6: memref<64x1xf32, #tpu.memory_space<vmem>>, %arg7: memref<1x1xf32, #tpu.memory_space<vmem>>, %arg8: memref<1x256xf32, #tpu.memory_space<vmem>>) attributes {dimension_semantics = [#tpu.dimension_semantics<parallel>], iteration_bounds = array<i64: 2>, scalar_prefetch = 0 : i64, scratch_operands = 0 : i64, tpu.core_type = #tpu.core_type<tc>, window_params = [{transform_indices = @transform_0, window_bounds = array<i64: 2, 256>}, {pipeline_mode = #tpu.pipeline_mode<synchronous>, transform_indices = @transform_1, window_bounds = array<i64: 64, 2>}, {pipeline_mode = #tpu.pipeline_mode<synchronous>, transform_indices = @transform_2, window_bounds = array<i64: 64, 1>}, {pipeline_mode = #tpu.pipeline_mode<synchronous>, transform_indices = @transform_3, window_bounds = array<i64: 64, 64>}, {pipeline_mode = #tpu.pipeline_mode<synchronous>, transform_indices = @transform_4, window_bounds = array<i64: 64, 1>}, {pipeline_mode = #tpu.pipeline_mode<synchronous>, transform_indices = @transform_5, window_bounds = array<i64: 64, 1>}, {pipeline_mode = #tpu.pipeline_mode<synchronous>, transform_indices = @transform_6, window_bounds = array<i64: 1, 1>}, {transform_indices = @transform_7, window_bounds = array<i64: 1, 256>}]} {
    %c0 = arith.constant 0 : index
    %c0_0 = arith.constant 0 : index
    %0 = vector.load %arg1[%c0, %c0_0] : memref<2x256xf32, #tpu.memory_space<vmem>>, vector<2x256xf32>
    %c0_1 = arith.constant 0 : index
    %c0_2 = arith.constant 0 : index
    %1 = vector.load %arg2[%c0_1, %c0_2] : memref<64x2xf32, #tpu.memory_space<vmem>>, vector<64x2xf32>
    %c0_3 = arith.constant 0 : index
    %c0_4 = arith.constant 0 : index
    %2 = vector.load %arg3[%c0_3, %c0_4] : memref<64x1xf32, #tpu.memory_space<vmem>>, vector<64x1xf32>
    %3 = vector.extract_strided_slice %1 {offsets = [0, 0], sizes = [64, 1], strides = [1, 1]} : vector<64x2xf32> to vector<64x1xf32>
    %4 = vector.extract_strided_slice %0 {offsets = [0, 0], sizes = [1, 256], strides = [1, 1]} : vector<2x256xf32> to vector<1x256xf32>
    %5 = vector.broadcast %3 : vector<64x1xf32> to vector<64x256xf32>
    %6 = vector.broadcast %4 : vector<1x256xf32> to vector<64x256xf32>
    %7 = arith.mulf %5, %6 : vector<64x256xf32>
    %8 = vector.broadcast %2 : vector<64x1xf32> to vector<64x256xf32>
    %9 = arith.addf %8, %7 : vector<64x256xf32>
    %10 = vector.extract_strided_slice %1 {offsets = [0, 1], sizes = [64, 1], strides = [1, 1]} : vector<64x2xf32> to vector<64x1xf32>
    %11 = vector.extract_strided_slice %0 {offsets = [1, 0], sizes = [1, 256], strides = [1, 1]} : vector<2x256xf32> to vector<1x256xf32>
    %12 = vector.broadcast %10 : vector<64x1xf32> to vector<64x256xf32>
    %13 = vector.broadcast %11 : vector<1x256xf32> to vector<64x256xf32>
    %14 = arith.mulf %12, %13 : vector<64x256xf32>
    %15 = arith.addf %9, %14 : vector<64x256xf32>
    %cst = arith.constant 0.000000e+00 : f32
    %16 = vector.broadcast %cst : f32 to vector<64x256xf32>
    %17 = arith.maximumf %15, %16 : vector<64x256xf32>
    %c0_5 = arith.constant 0 : index
    %c0_6 = arith.constant 0 : index
    %18 = vector.load %arg4[%c0_5, %c0_6] : memref<64x64xbf16, #tpu.memory_space<vmem>>, vector<64x64xbf16>
    %19 = arith.truncf %17 : vector<64x256xf32> to vector<64x256xbf16>
    %cst_7 = arith.constant dense<0.000000e+00> : vector<64x256xf32>
    %20 = tpu.matmul %18, %19, %cst_7 {dimension_numbers = #tpu.dot_dimension_numbers<[1], [0], [0], [1], [0, 0, 1, 1], [], []>} : vector<64x64xbf16>, vector<64x256xbf16>, vector<64x256xf32> -> vector<64x256xf32>
    %c0_8 = arith.constant 0 : index
    %c0_9 = arith.constant 0 : index
    %21 = vector.load %arg5[%c0_8, %c0_9] : memref<64x1xf32, #tpu.memory_space<vmem>>, vector<64x1xf32>
    %22 = vector.broadcast %21 : vector<64x1xf32> to vector<64x256xf32>
    %23 = arith.addf %20, %22 : vector<64x256xf32>
    %cst_10 = arith.constant 0.000000e+00 : f32
    %24 = vector.broadcast %cst_10 : f32 to vector<64x256xf32>
    %25 = arith.maximumf %23, %24 : vector<64x256xf32>
    %c0_11 = arith.constant 0 : index
    %c0_12 = arith.constant 0 : index
    %26 = vector.load %arg6[%c0_11, %c0_12] : memref<64x1xf32, #tpu.memory_space<vmem>>, vector<64x1xf32>
    %27 = vector.broadcast %26 : vector<64x1xf32> to vector<64x256xf32>
    %28 = arith.mulf %27, %25 : vector<64x256xf32>
    %cst_13 = arith.constant dense<0.000000e+00> : vector<256xf32>
    %29 = vector.multi_reduction <add>, %28, %cst_13 [0] : vector<64x256xf32> to vector<256xf32>
    %30 = vector.shape_cast %29 : vector<256xf32> to vector<1x256xf32>
    %c0_14 = arith.constant 0 : index
    %c0_15 = arith.constant 0 : index
    %31 = vector.load %arg7[%c0_14, %c0_15] : memref<1x1xf32, #tpu.memory_space<vmem>>, vector<1x1xf32>
    %32 = vector.broadcast %31 : vector<1x1xf32> to vector<1x256xf32>
    %33 = arith.addf %30, %32 : vector<1x256xf32>
    %cst_16 = arith.constant 5.000000e-01 : f32
    %34 = vector.broadcast %cst_16 : f32 to vector<1x256xf32>
    %35 = arith.mulf %34, %33 : vector<1x256xf32>
    %36 = math.tanh %35 : vector<1x256xf32>
    %cst_17 = arith.constant 1.000000e+00 : f32
    %37 = vector.broadcast %cst_17 : f32 to vector<1x256xf32>
    %38 = arith.addf %37, %36 : vector<1x256xf32>
    %cst_18 = arith.constant 5.000000e-01 : f32
    %39 = vector.broadcast %cst_18 : f32 to vector<1x256xf32>
    %40 = arith.mulf %39, %38 : vector<1x256xf32>
    %c0_19 = arith.constant 0 : index
    %c0_20 = arith.constant 0 : index
    %41 = vector.load %arg8[%c0_19, %c0_20] : memref<1x256xf32, #tpu.memory_space<vmem>>, vector<1x256xf32>
    tpu.vector_store %arg8[%c0_19, %c0_20], %40 {strides = array<i32>} : memref<1x256xf32, #tpu.memory_space<vmem>>, vector<1x256xf32>,
    return
  }
  func.func @transform_0(%arg0: i32) -> (i32, i32) {
    %c0_i32 = arith.constant 0 : i32
    %c0_i32_0 = arith.constant 0 : i32
    return %c0_i32, %arg0 : i32, i32
  }
  func.func @transform_1(%arg0: i32) -> (i32, i32) {
    %c0_i32 = arith.constant 0 : i32
    %c0_i32_0 = arith.constant 0 : i32
    %c0_i32_1 = arith.constant 0 : i32
    return %c0_i32, %c0_i32_0 : i32, i32
  }
  func.func @transform_2(%arg0: i32) -> (i32, i32) {
    %c0_i32 = arith.constant 0 : i32
    %c0_i32_0 = arith.constant 0 : i32
    %c0_i32_1 = arith.constant 0 : i32
    return %c0_i32, %c0_i32_0 : i32, i32
  }
  func.func @transform_3(%arg0: i32) -> (i32, i32) {
    %c0_i32 = arith.constant 0 : i32
    %c0_i32_0 = arith.constant 0 : i32
    %c0_i32_1 = arith.constant 0 : i32
    return %c0_i32, %c0_i32_0 : i32, i32
  }
  func.func @transform_4(%arg0: i32) -> (i32, i32) {
    %c0_i32 = arith.constant 0 : i32
    %c0_i32_0 = arith.constant 0 : i32
    %c0_i32_1 = arith.constant 0 : i32
    return %c0_i32, %c0_i32_0 : i32, i32
  }
  func.func @transform_5(%arg0: i32) -> (i32, i32) {
    %c0_i32 = arith.constant 0 : i32
    %c0_i32_0 = arith.constant 0 : i32
    %c0_i32_1 = arith.constant 0 : i32
    return %c0_i32, %c0_i32_0 : i32, i32
  }
  func.func @transform_6(%arg0: i32) -> (i32, i32) {
    %c0_i32 = arith.constant 0 : i32
    %c0_i32_0 = arith.constant 0 : i32
    %c0_i32_1 = arith.constant 0 : i32
    return %c0_i32, %c0_i32_0 : i32, i32
  }
  func.func @transform_7(%arg0: i32) -> (i32, i32) {
    %c0_i32 = arith.constant 0 : i32
    %c0_i32_0 = arith.constant 0 : i32
    return %c0_i32, %arg0 : i32, i32
  }
}

</mosaic_0001>

<bundles_post_ra>
// kernel: tpu_custom_call.1
= control target key start
LH: loop header
LB: loop body
LE: loop exit
PB: predicated region body
PF: predicated region fallthrough
CT: control target
= control target key end

     0   :  { %s1390_s0 = inlined_call_operand.vmem [shape: f32[2,512], index: 0, kind: input, shape index: {}]   ;;  %s1391_s1 = inlined_call_operand.vmem [shape: f32[64,2], index: 1, kind: input, shape index: {}]   ;;  %s1392_s2 = inlined_call_operand.vmem [shape: f32[64,1], index: 2, kind: input, shape index: {}]   ;;  %s1393_s3 = inlined_call_operand.vmem [shape: bf16[64,64], index: 3, kind: input, shape index: {}]   ;;  %s1394_s4 = inlined_call_operand.vmem [shape: f32[64,1], index: 4, kind: input, shape index: {}]   ;;  %s1395_s5 = inlined_call_operand.vmem [shape: f32[64,1], index: 5, kind: input, shape index: {}]   ;;  %s1396_s6 = inlined_call_operand.<no memory space> [shape: f32[1,1], index: 6, kind: input, shape index: {}]   ;;  %s1397_s7 = inlined_call_operand.hbm [shape: f32[1,512], index: 7, kind: output, shape index: {}]  }
   0x1   :  { %v12_v0 = vstv %s1396_s6 }
   0x2   :  { %13 = vst [vmem:[#allocation2] sm:$0x1] %v12_v0 }
   0x3   :  { %14 = vsyncpa [#allocation4], 0 }
   0x4   :  { %16 = vsyncpa [#allocation4 + $0x1], 0  ;;  %s1122_s26 = smov 0   ;;  %s1124_s27 = smov 0  }
   0x5   :  { %s1126_s28 = smov 0   ;;  %s1128_s29 = smov 0  }
   0x6 LB: > { %s1143_s6 = sadd.s32 4294967295, %s1073_s29   ;;  %s922_s30 = sadd.s32 4294967294, %s1073_s29   ;;  %s1073_s29 = sphi %s1128_s29, %s1403_s29   ;;  %s1069_s28 = sphi %s1126_s28, %s1402_s28   ;;  %s1065_s27 = sphi %s1124_s27, %s1401_s27   ;;  %s1061_s26 = sphi %s1122_s26, %s1400_s26  }
   0x7   : > { %s1147_s8 = sadd.s32 1, %s1073_s29   ;;  %s181_s9 = sadd.s32 1, %s1069_s28 }
   0x8   : > { %s178_s10 = ssub.s32 %s1073_s29, %s1147_s8  ;;  %p191_p0 = scmp.ne.s32.totalorder %s1069_s28, %s1065_s27 }
   0x9   : > { %p179_p1 = scmp.eq.s32.totalorder %s178_s10, 0  ;;  %p192_p2 = scmp.eq.s32.totalorder %s1143_s6, 1 }
   0xa   : > { %p197_p3 = scmp.ne.s32.totalorder %s1065_s27, %s1061_s26  ;;  %p198_p4 = scmp.eq.s32.totalorder %s922_s30, 1 }
   0xb   : > { %s1158_s11 = scalar_select %p179_p1, %s1069_s28, %s181_s9  }
   0xc   : > { %p1160_p5 = por %p192_p2, %p191_p0  ;;  %p1164_p6 = por %p198_p4, %p197_p3 }
   0xd   : > { %p925_p7 = scmp.ge.s32.totalorder %s1073_s29, 1  ;;  %p243_p8 = scmp.lt.s32.totalorder %s1073_s29, 3 }
   0xf   : > { %p244_p9 = pnand %p925_p7, %p243_p8 }
  0x10   : > { %s927_s18 = sshll.u32 (!%p244_p9), %s1143_s6, 1  ;;  %s272_s16 = sand.u32 (!%p244_p9), 1, %s1065_s27  }
  0x11   : > { %247 = sbr.rel (%p244_p9) target bundleno = 499 (0x1f3), region = 48  ;;  %p276_p10 = scmp.lt.s32.totalorder (!%p244_p9), %s927_s18, 3 }
  0x12   : > { %s926_s17 = sshll.u32 (!%p244_p9), %s272_s16, 1  ;;  %s849_s24 = scalar_lea.sflag (!%p244_p9), [#allocation4], %s272_s16 }
  0x13   : > { %s1078_s30 = smov (!%p244_p9), [#allocation3]  }
  0x16   : > { %v298_v1 = vld [vmem:[%s1392_s2 + $0x30] sm:$0xff]  ;;  %v1075_v3 = vmov 0   ;;  %v299_v4 = vld [vmem:[%s1392_s2 + $0x38] sm:$0xff]  ;;  %v289_v6 = vld [vmem:[%s1391_s1 + $0x28] sm:$0xff]  ;;  %v1076_v7 = vmov 1   ;;  %s1405_s18 = smov (!%p276_p10, %s927_s18), 3  ;;  %v341_v36 = vlaneseq }
  0x17   : > { %v290_v2 = vld [vmem:[%s1391_s1 + $0x30] sm:$0xff]  ;;  %994 = vset.pattern.permute.xlu1 %v1075_v3  ;;  %993 = vset.pattern.permute.xlu0 %v1075_v3  ;;  %v291_v5 = vld [vmem:[%s1391_s1 + $0x38] sm:$0xff]  ;;  %v288_v9 = vld [vmem:[%s1391_s1 + $0x20] sm:$0xff]  ;;  %s928_s19 = sshll.u32 %s1405_s18, 1  ;;  %vm613_vm0 = vcmask 523264   ;;  %s942_s18 = sshll.u32 %s1143_s6, 5 }
  0x18   : > { %407 = vperm.xlu1 %994, %v298_v1   ;;  %332 = vperm.xlu0 %993, %v290_v2   ;;  %v287_v8 = vld [vmem:[%s1391_s1 + $0x18] sm:$0xff]  ;;  %v285_v10 = vld [vmem:[%s1391_s1 + $0x8] sm:$0xff]  ;;  %v296_v11 = vld [vmem:[%s1392_s2 + $0x20] sm:$0xff]  ;;  %v1277_v39 = vshrl.u32 %v341_v36, 7  ;;  %s279_s22 = scalar_lea.vmem %s1390_s0, %s928_s19  ;;  %s274_s19 = scalar_lea.vmem [#allocation3], %s926_s17  ;;  %vm845_vm1 = vcmp.lt.s32.totalorder %v341_v36, 256 }
  0x19   : > { %658 = vmatprep.mubr.bf16.mxu0 %v1075_v3  ;;  %678 = vmatprep.mubr.bf16.mxu1 %v1075_v3  ;;  %v297_v12 = vld [vmem:[%s1392_s2 + $0x28] sm:$0xff]  ;;  %v286_v13 = vld [vmem:[%s1391_s1 + $0x10] sm:$0xff]  ;;  %v284_v14 = vld [vmem:[%s1391_s1] sm:$0xff]  ;;  %s863_s20 = sshll.u32 %s274_s19, 4  ;;  %s861_s23 = scalar_lea.hbm %s1397_s7, %s942_s18  ;;  %s864_s20 = int_to_ptr.vmem [resolvable:$true] %s863_s20 }
  0x1a   : > { %v294_v15 = vld [vmem:[%s1392_s2 + $0x10] sm:$0xff]  ;;  %v295_v16 = vld [vmem:[%s1392_s2 + $0x18] sm:$0xff]  ;;  %v292_v17 = vld [vmem:[%s1392_s2] sm:$0xff]  ;;  %v1283_v42 = vsub.s32 0, %v1277_v39  ;;  %v347_v43 = vsub.s32 2, %v1277_v39  ;;  %v465_v45 = vsub.s32 1, %v1277_v39 }
  0x1b   : > { %v293_v18 = vld [vmem:[%s1392_s2 + $0x8] sm:$0xff]  ;;  %v545_v19 = vld [vmem:[%s1394_s4] sm:$0xff]  ;;  %v547_v21 = vld [vmem:[%s1394_s4 + $0x10] sm:$0xff]  ;;  %v469_v46 = vsub.s32 3, %v1277_v39  ;;  %s1013_s25 = scalar_lea.vmem %s864_s20, 32  ;;  %s1017_s6 = sshll.u32 %s1078_s30, 4  ;;  %s1018_s6 = int_to_ptr.vmem [resolvable:$false] %s1017_s6 }
  0x1c   : > { %412 = vperm.xlu1 %994, %v299_v4   ;;  %337 = vperm.xlu0 %993, %v291_v5   ;;  %v546_v20 = vld [vmem:[%s1394_s4 + $0x8] sm:$0xff]  ;;  %v715_v22 = vld [vmem:[%s1395_s5] sm:$0xff]  ;;  %v548_v23 = vld [vmem:[%s1394_s4 + $0x18] sm:$0xff]  ;;  %p1014_p11 = scmp.ne.s32.totalorder %s864_s20, %s1013_s25  ;;  %s1019_s9 = scalar_lea.vmem %s1018_s6, 64 }
  0x1d   : > { %v549_v24 = vld [vmem:[%s1394_s4 + $0x20] sm:$0xff]  ;;  %v716_v25 = vld [vmem:[%s1395_s5 + $0x8] sm:$0xff]  ;;  %v717_v27 = vld [vmem:[%s1395_s5 + $0x10] sm:$0xff]  ;;  %p1020_p0 = scmp.lt.s32.totalorder %s864_s20, %s1018_s6  ;;  %p1021_p1 = scmp.lt.s32.totalorder %s1019_s9, %s1013_s25 }
  0x1e   : > { %v550_v26 = vld [vmem:[%s1394_s4 + $0x28] sm:$0xff]  ;;  %v551_v28 = vld [vmem:[%s1394_s4 + $0x30] sm:$0xff]  ;;  %v718_v29 = vld [vmem:[%s1395_s5 + $0x18] sm:$0xff]  ;;  %p1015_p12 = pnand %p1014_p11, %p1160_p5 }
  0x1f   : > { %v552_v30 = vld [vmem:[%s1394_s4 + $0x38] sm:$0xff]  ;;  %v719_v31 = vld [vmem:[%s1395_s5 + $0x20] sm:$0xff]  ;;  %v721_v32 = vld [vmem:[%s1395_s5 + $0x30] sm:$0xff]  ;;  %p1022_p2 = por %p1021_p1, %p1020_p0 }
  0x20   : > { %995 = vset.pattern.permute.xlu1 %v1076_v7  ;;  %327 = vperm.xlu0 %993, %v289_v6   ;;  %v720_v33 = vld [vmem:[%s1395_s5 + $0x28] sm:$0xff]  ;;  %v805_v34 = vld [vmem:[#allocation2] sm:$0x1]  ;;  %v722_v35 = vld [vmem:[%s1395_s5 + $0x38] sm:$0xff]  ;;  %p1016_p13 = pneg %p1015_p12 }
  0x21   : > { %460 = vperm.xlu1 %995, %v291_v5   ;;  %v283_v44 = vld [vmem:[%s279_s22] sm:$0xf] }
  0x22   : > { %v344_v48 = vrot.slane %v283_v44, %v1283_v42  ;;  %v348_v49 = vrot.slane %v283_v44, %v347_v43  ;;  %v466_v51 = vrot.slane %v283_v44, %v465_v45  ;;  %v470_v52 = vrot.slane %v283_v44, %v469_v46  ;;  %p1023_p3 = pnand %p1022_p2, %p1016_p13 }
  0x24   : > { %317 = vperm.xlu0 %993, %v287_v8   ;;  %v1292_v54 = vrot.slane %v344_v48, %v1283_v42  ;;  %v1295_v55 = vrot.slane %v348_v49, %v1283_v42  ;;  %v1297_v57 = vrot.slane %v466_v51, %v465_v45  ;;  %v1299_v58 = vrot.slane %v470_v52, %v465_v45 }
  0x25   : > { %996 = vset.pattern.permute.xlu1 %v1075_v3 }
  0x26   : > { %322 = vperm.xlu1 %996, %v288_v9  }
  0x28   : > { %307 = vperm.xlu0 %993, %v285_v10  }
  0x2a   : > { %397 = vperm.xlu1 %996, %v296_v11  }
  0x2c   : > { %1001 = vset.pattern.permute.xlu0 %v1076_v7 }
  0x2d   : > { %456 = vperm.xlu0 %1001, %v290_v2  }
  0x2e   : > { %402 = vperm.xlu1 %996, %v297_v12  }
  0x31   : > { %448 = vperm.xlu0 %1001, %v288_v9  }
  0x32   : > { %997 = vset.pattern.permute.xlu1 %v1076_v7 }
  0x33   : > { %452 = vperm.xlu1 %997, %v289_v6  }
  0x35   : > { %440 = vperm.xlu0 %1001, %v286_v13  }
  0x37   : > { %998 = vset.pattern.permute.xlu1 %v1075_v3 }
  0x38   : > { %312 = vperm.xlu1 %998, %v286_v13  }
  0x39   : > { %432 = vperm.xlu0 %1001, %v284_v14  }
  0x3c   : > { %387 = vperm.xlu1 %998, %v294_v15  }
  0x3d   : > { %1004 = vset.pattern.permute.xlu0 %v1075_v3 }
  0x3e   : > { %560 = vperm.xlu0 %1004, %v546_v20  }
  0x40   : > { %392 = vperm.xlu1 %998, %v295_v16  }
  0x42   : > { %725 = vperm.xlu0 %1004, %v715_v22  }
  0x44   : > { %999 = vset.pattern.permute.xlu1 %v1076_v7 }
  0x45   : > { %444 = vperm.xlu1 %999, %v287_v8  }
  0x46   : > { %575 = vperm.xlu0 %1004, %v549_v24  }
  0x49   : > { %1000 = vset.pattern.permute.xlu1 %v1075_v3 }
  0x4a   : > { %302 = vperm.xlu1 %1000, %v284_v14   ;;  %580 = vperm.xlu0 %1004, %v550_v26  }
  0x4e   : > { %377 = vperm.xlu1 %1000, %v292_v17   ;;  %585 = vperm.xlu0 %1004, %v551_v28  }
  0x52   : > { %382 = vperm.xlu1 %1000, %v293_v18   ;;  %590 = vperm.xlu0 %1004, %v552_v30  }
  0x56   : > { %1002 = vset.pattern.permute.xlu1 %v1076_v7  ;;  %755 = vperm.xlu0 %1004, %v721_v32  }
  0x57   : > { %436 = vperm.xlu1 %1002, %v285_v10  }
  0x5a   : > { %808 = vperm.xlu0 %1004, %v805_v34  }
  0x5b   : > { %1003 = vset.pattern.permute.xlu1 %v1075_v3 }
  0x5c   : > { %555 = vperm.xlu1 %1003, %v545_v19  }
  0x60   : > { %565 = vperm.xlu1 %1003, %v547_v21  }
  0x64   : > { %570 = vperm.xlu1 %1003, %v548_v23  }
  0x68   : > { %730 = vperm.xlu1 %1003, %v716_v25  }
  0x6c   : > { %735 = vperm.xlu1 %1003, %v717_v27  }
  0x70   : > { %740 = vperm.xlu1 %1003, %v718_v29  }
  0x74   : > { %745 = vperm.xlu1 %1003, %v719_v31  }
  0x78   : > { %750 = vperm.xlu1 %1003, %v720_v33  }
  0x7c   : > { %760 = vperm.xlu1 %1003, %v722_v35  }
  0x93   : > { %v408_v37 = vpop.permute.xlu1 %407  ;;  %v333_v38 = vpop.permute.xlu0 %332 }
  0x94   : > { %v371_v60 = vmul.f32 %v1292_v54, %v333_v38  ;;  %v372_v61 = vmul.f32 %v1295_v55, %v333_v38 }
  0x96   : > { %v427_v4 = vadd.f32 %v408_v37, %v371_v60  ;;  %v428_v5 = vadd.f32 %v408_v37, %v372_v61 }
  0x97   : > { %v413_v40 = vpop.permute.xlu1 %412  ;;  %v338_v41 = vpop.permute.xlu0 %337 }
  0x98   : > { %v373_v62 = vmul.f32 %v1292_v54, %v338_v41  ;;  %v374_v63 = vmul.f32 %v1295_v55, %v338_v41 }
  0x9a   : > { %v429_v6 = vadd.f32 %v413_v40, %v373_v62  ;;  %v430_v7 = vadd.f32 %v413_v40, %v374_v63 }
  0x9b   : > { %v328_v47 = vpop.permute.xlu0 %327 }
  0x9c   : > { %v461_v50 = vpop.permute.xlu1 %460  ;;  %v369_v9 = vmul.f32 %v1292_v54, %v328_v47  ;;  %v370_v10 = vmul.f32 %v1295_v55, %v328_v47 }
  0x9d   : > { %v495_v1 = vmul.f32 %v1297_v57, %v461_v50  ;;  %v496_v2 = vmul.f32 %v1299_v58, %v461_v50 }
  0x9f   : > { %v1289_v53 = vpop.permute.xlu0 %317  ;;  %v511_v14 = vadd.f32 %v495_v1, %v429_v6  ;;  %v512_v15 = vadd.f32 %v496_v2, %v430_v7 }
  0xa0   : > { %v365_v1 = vmul.f32 %v1292_v54, %v1289_v53  ;;  %v366_v2 = vmul.f32 %v1295_v55, %v1289_v53 }
  0xa1   : > { %v323_v56 = vpop.permute.xlu1 %322  ;;  %v528_v30 = vmax.f32 %v512_v15, 0.0  ;;  %v527_v31 = vmax.f32 %v511_v14, 0.0 }
  0xa2   : > { %v367_v16 = vmul.f32 %v1292_v54, %v323_v56  ;;  %v368_v17 = vmul.f32 %v1295_v55, %v323_v56 }
  0xa3   : > { %v1301_v59 = vpop.permute.xlu0 %307 }
  0xa5   : > { %v398_v0 = vpop.permute.xlu1 %397 }
  0xa6   : > { %v423_v20 = vadd.f32 %v398_v0, %v367_v16  ;;  %v424_v21 = vadd.f32 %v398_v0, %v368_v17 }
  0xa8   : > { %v457_v8 = vpop.permute.xlu0 %456 }
  0xa9   : > { %v493_v11 = vmul.f32 %v1297_v57, %v457_v8  ;;  %v494_v12 = vmul.f32 %v1299_v58, %v457_v8  ;;  %v403_v13 = vpop.permute.xlu1 %402 }
  0xaa   : > { %v425_v27 = vadd.f32 %v403_v13, %v369_v9  ;;  %v426_v28 = vadd.f32 %v403_v13, %v370_v10 }
  0xab   : > { %v509_v18 = vadd.f32 %v493_v11, %v427_v4  ;;  %v510_v19 = vadd.f32 %v494_v12, %v428_v5 }
  0xac   : > { %v449_v22 = vpop.permute.xlu0 %448 }
  0xad   : > { %v489_v23 = vmul.f32 %v1297_v57, %v449_v22  ;;  %v490_v24 = vmul.f32 %v1299_v58, %v449_v22  ;;  %v526_v25 = vmax.f32 %v510_v19, 0.0  ;;  %v525_v26 = vmax.f32 %v509_v18, 0.0 }
  0xae   : > { %v453_v29 = vpop.permute.xlu1 %452 }
  0xaf   : > { %v505_v32 = vadd.f32 %v489_v23, %v423_v20  ;;  %v506_v33 = vadd.f32 %v490_v24, %v424_v21  ;;  %v491_v34 = vmul.f32 %v1297_v57, %v453_v29  ;;  %v492_v35 = vmul.f32 %v1299_v58, %v453_v29 }
  0xb0   : > { %v544_v37 = vpack.c.bf16 %v528_v30, %v526_v25  ;;  %v543_v38 = vpack.c.bf16 %v527_v31, %v525_v26  ;;  %v441_v51 = vpop.permute.xlu0 %440  ;;  %v362_v29 = vmul.f32 %v1295_v55, %v1301_v59 }
  0xb1   : > { %v507_v40 = vadd.f32 %v491_v34, %v425_v27  ;;  %v508_v41 = vadd.f32 %v492_v35, %v426_v28  ;;  %v521_v43 = vmax.f32 %v505_v32, 0.0  ;;  %v522_v44 = vmax.f32 %v506_v33, 0.0 }
  0xb2   : > { %634 = vmatprep.subr.bf16.mxu0 %v544_v37  ;;  %943 = vmatprep.subr.bf16.mxu1 %v544_v37  ;;  %v485_v63 = vmul.f32 %v1297_v57, %v441_v51  ;;  %v486_v0 = vmul.f32 %v1299_v58, %v441_v51  ;;  %v361_v28 = vmul.f32 %v1292_v54, %v1301_v59  ;;  %v1008_v59 = vld [vmem:[%s1393_s3 + $0x18] sm:$0xff]  }
  0xb3   : > { %v523_v45 = vmax.f32 %v507_v40, 0.0  ;;  %v524_v46 = vmax.f32 %v508_v41, 0.0  ;;  %635 = vmatpush1.bf16.msra.mxu0 %v543_v38  ;;  %947 = vmatpush1.bf16.msra.mxu1 %v543_v38  ;;  %v313_v47 = vpop.permute.xlu1 %312 }
  0xb4   : > { %v363_v52 = vmul.f32 %v1292_v54, %v313_v47  ;;  %v364_v56 = vmul.f32 %v1295_v55, %v313_v47  ;;  %v433_v22 = vpop.permute.xlu0 %432 }
  0xb5   : > { %v542_v48 = vpack.c.bf16 %v524_v46, %v522_v44  ;;  %v541_v49 = vpack.c.bf16 %v523_v45, %v521_v43  ;;  %v481_v26 = vmul.f32 %v1297_v57, %v433_v22  ;;  %v482_v27 = vmul.f32 %v1299_v58, %v433_v22 }
  0xb7   : > { %v388_v50 = vpop.permute.xlu1 %387  ;;  %636 = vmatprep.subr.bf16.mxu0 %v542_v48  ;;  %944 = vmatprep.subr.bf16.mxu1 %v542_v48 }
  0xb8   : > { %637 = vmatpush1.bf16.msra.mxu0 %v541_v49  ;;  %948 = vmatpush1.bf16.msra.mxu1 %v541_v49  ;;  %v419_v61 = vadd.f32 %v388_v50, %v363_v52  ;;  %v420_v62 = vadd.f32 %v388_v50, %v364_v56 }
  0xb9   : > { %v561_v49 = vpop.permute.xlu0 %560 }
  0xba   : > { %v501_v4 = vadd.f32 %v485_v63, %v419_v61  ;;  %v502_v5 = vadd.f32 %v486_v0, %v420_v62 }
  0xbb   : > { %v393_v60 = vpop.permute.xlu1 %392 }
  0xbc   : > { %v421_v7 = vadd.f32 %v393_v60, %v365_v1  ;;  %v422_v8 = vadd.f32 %v393_v60, %v366_v2  ;;  %v517_v13 = vmax.f32 %v501_v4, 0.0  ;;  %v518_v14 = vmax.f32 %v502_v5, 0.0 }
  0xbd   : > { %v726_v51 = vpop.permute.xlu0 %725 }
  0xc0   : > { %v445_v6 = vpop.permute.xlu1 %444 }
  0xc1   : > { %v487_v9 = vmul.f32 %v1297_v57, %v445_v6  ;;  %v488_v10 = vmul.f32 %v1299_v58, %v445_v6  ;;  %v576_v56 = vpop.permute.xlu0 %575 }
  0xc3   : > { %v503_v11 = vadd.f32 %v487_v9, %v421_v7  ;;  %v504_v12 = vadd.f32 %v488_v10, %v422_v8 }
  0xc5   : > { %v519_v15 = vmax.f32 %v503_v11, 0.0  ;;  %v520_v16 = vmax.f32 %v504_v12, 0.0  ;;  %v303_v17 = vpop.permute.xlu1 %302  ;;  %v581_v0 = vpop.permute.xlu0 %580 }
  0xc6   : > { %v359_v53 = vmul.f32 %v1292_v54, %v303_v17  ;;  %v360_v21 = vmul.f32 %v1295_v55, %v303_v17  ;;  %v1005_v55 = vld [vmem:[%s1393_s3] sm:$0xff]  }
  0xc7   : > { %v540_v18 = vpack.c.bf16 %v520_v16, %v518_v14  ;;  %v539_v19 = vpack.c.bf16 %v519_v15, %v517_v13 }
  0xc9   : > { %v378_v20 = vpop.permute.xlu1 %377  ;;  %638 = vmatprep.subr.bf16.mxu0 %v540_v18  ;;  %945 = vmatprep.subr.bf16.mxu1 %v540_v18  ;;  %v586_v14 = vpop.permute.xlu0 %585 }
  0xca   : > { %639 = vmatpush1.bf16.msra.mxu0 %v539_v19  ;;  %949 = vmatpush1.bf16.msra.mxu1 %v539_v19  ;;  %v415_v24 = vadd.f32 %v378_v20, %v359_v53  ;;  %v416_v25 = vadd.f32 %v378_v20, %v360_v21 }
  0xcc   : > { %v497_v30 = vadd.f32 %v481_v26, %v415_v24  ;;  %v498_v31 = vadd.f32 %v482_v27, %v416_v25 }
  0xcd   : > { %v383_v23 = vpop.permute.xlu1 %382 }
  0xce   : > { %v417_v33 = vadd.f32 %v383_v23, %v361_v28  ;;  %v418_v34 = vadd.f32 %v383_v23, %v362_v29  ;;  %v513_v41 = vmax.f32 %v497_v30, 0.0  ;;  %v514_v43 = vmax.f32 %v498_v31, 0.0 }
  0xd2   : > { %v437_v32 = vpop.permute.xlu1 %436 }
  0xd3   : > { %v483_v35 = vmul.f32 %v1297_v57, %v437_v32  ;;  %v484_v37 = vmul.f32 %v1299_v58, %v437_v32  ;;  %v1006_v57 = vld [vmem:[%s1393_s3 + $0x10] sm:$0xff]   ;;  %v1007_v58 = vld [vmem:[%s1393_s3 + $0x8] sm:$0xff]  }
  0xd5   : > { %v499_v38 = vadd.f32 %v483_v35, %v417_v33  ;;  %v500_v40 = vadd.f32 %v484_v37, %v418_v34 }
  0xd7   : > { %v515_v44 = vmax.f32 %v499_v38, 0.0  ;;  %v516_v45 = vmax.f32 %v500_v40, 0.0  ;;  %v556_v47 = vpop.permute.xlu1 %555 }
  0xd9   : > { %v538_v46 = vpack.c.bf16 %v516_v45, %v514_v43  ;;  %v537_v54 = vpack.c.bf16 %v515_v44, %v513_v41 }
  0xdb   : > { %640 = vmatprep.subr.bf16.mxu0 %v538_v46  ;;  %946 = vmatprep.subr.bf16.mxu1 %v538_v46  ;;  %v566_v48 = vpop.permute.xlu1 %565  ;;  %v591_v46 = vpop.permute.xlu0 %590 }
  0xdc   : > { %641 = vmatpush1.bf16.msra.mxu0 %v537_v54  ;;  %950 = vmatpush1.bf16.msra.mxu1 %v537_v54 }
  0xdf   : > { %933 = vmatmul.mubr.msk.bf16.vlgmr.msra.gmra.mxu0 %vm613_vm0, %v1005_v55  ;;  %935 = vmatmul.mubr.msk.bf16.vlgmr.msra.gmra.mxu1 %vm613_vm0, %v1006_v57  ;;  %v571_v50 = vpop.permute.xlu1 %570 }
  0xe0   : > { %668 = vmatprep.mubr.bf16.mxu0 %v1075_v3  ;;  %688 = vmatprep.mubr.bf16.mxu1 %v1075_v3 }
  0xe3   : > { %v731_v52 = vpop.permute.xlu1 %730 }
  0xe7   : > { %934 = vmatmul.mubr.msk.bf16.gmra.mxu0 %vm613_vm0, %v1007_v58  ;;  %936 = vmatmul.mubr.msk.bf16.gmra.mxu1 %vm613_vm0, %v1008_v59  ;;  %v736_v60 = vpop.permute.xlu1 %735 }
  0xeb   : > { %v741_v4 = vpop.permute.xlu1 %740 }
  0xef   : > { %v746_v21 = vpop.permute.xlu1 %745 }
 0x19f   : > { %v660_v61 = vpop.f32.mrf.mxu0  ;;  %v680_v3 = vpop.f32.mrf.mxu1 }
 0x1a0   : > { %v661_v5 = vadd.f32 %v660_v61, %v556_v47  ;;  %v681_v16 = vadd.f32 %v680_v3, %v576_v56 }
 0x1a1   : > { %v662_v62 = vpop.f32.mrf.mxu0  ;;  %v682_v63 = vpop.f32.mrf.mxu1 }
 0x1a2   : > { %v663_v6 = vadd.f32 %v662_v62, %v556_v47  ;;  %v699_v15 = vmax.f32 %v661_v5, 0.0  ;;  %v683_v22 = vadd.f32 %v682_v63, %v576_v56  ;;  %v707_v31 = vmax.f32 %v681_v16, 0.0  ;;  %v751_v56 = vpop.permute.xlu1 %750 }
 0x1a3   : > { %v664_v1 = vpop.f32.mrf.mxu0  ;;  %v684_v2 = vpop.f32.mrf.mxu1 }
 0x1a4   : > { %v665_v7 = vadd.f32 %v664_v1, %v561_v49  ;;  %v700_v19 = vmax.f32 %v663_v6, 0.0  ;;  %v685_v25 = vadd.f32 %v684_v2, %v581_v0  ;;  %v763_v30 = vmul.f32 %v726_v51, %v699_v15 }
 0x1a5   : > { %v666_v8 = vpop.f32.mrf.mxu0  ;;  %v686_v9 = vpop.f32.mrf.mxu1  ;;  %v708_v41 = vmax.f32 %v683_v22, 0.0 }
 0x1a6   : > { %v667_v10 = vadd.f32 %v666_v8, %v561_v49  ;;  %v701_v11 = vmax.f32 %v665_v7, 0.0  ;;  %v764_v34 = vmul.f32 %v726_v51, %v700_v19  ;;  %v687_v35 = vadd.f32 %v686_v9, %v581_v0  ;;  %v756_v8 = vpop.permute.xlu0 %755 }
 0x1a7   : > { %v670_v12 = vpop.f32.mrf.mxu0  ;;  %v690_v13 = vpop.f32.mrf.mxu1  ;;  %v709_v54 = vmax.f32 %v685_v25, 0.0  ;;  %v771_v51 = vmul.f32 %v746_v21, %v707_v31  ;;  %v772_v2 = vmul.f32 %v746_v21, %v708_v41  ;;  %v1077_v41 = vmov 1966171168  }
 0x1a8   : > { %v702_v17 = vmax.f32 %v667_v10, 0.0  ;;  %v671_v18 = vadd.f32 %v670_v12, %v566_v48  ;;  %v765_v23 = vmul.f32 %v731_v52, %v701_v11  ;;  %v691_v37 = vadd.f32 %v690_v13, %v586_v14 }
 0x1a9   : > { %v672_v20 = vpop.f32.mrf.mxu0  ;;  %v692_v53 = vpop.f32.mrf.mxu1  ;;  %v710_v61 = vmax.f32 %v687_v35, 0.0 }
 0x1aa   : > { %v703_v24 = vmax.f32 %v671_v18, 0.0  ;;  %v766_v26 = vmul.f32 %v731_v52, %v702_v17  ;;  %v673_v27 = vadd.f32 %v672_v20, %v566_v48  ;;  %v779_v43 = vadd.f32 %v765_v23, %v763_v30 }
 0x1ab   : > { %v674_v28 = vpop.f32.mrf.mxu0  ;;  %v694_v29 = vpop.f32.mrf.mxu1  ;;  %v693_v58 = vadd.f32 %v692_v53, %v586_v14  ;;  %v711_v3 = vmax.f32 %v691_v37, 0.0  ;;  %v774_v9 = vmul.f32 %v751_v56, %v710_v61 }
 0x1ac   : > { %v767_v32 = vmul.f32 %v736_v60, %v703_v24  ;;  %v675_v33 = vadd.f32 %v674_v28, %v571_v50  ;;  %v704_v38 = vmax.f32 %v673_v27, 0.0  ;;  %v792_v55 = vadd.f32 %v766_v26, %v764_v34  ;;  %v761_v14 = vpop.permute.xlu1 %760  ;;  %v809_v28 = vpop.permute.xlu0 %808 }
 0x1ad   : > { %v676_v40 = vpop.f32.mrf.mxu0  ;;  %v696_v59 = vpop.f32.mrf.mxu1  ;;  %v695_v49 = vadd.f32 %v694_v29, %v591_v46  ;;  %v712_v5 = vmax.f32 %v693_v58, 0.0  ;;  %v775_v10 = vmul.f32 %v756_v8, %v711_v3  ;;  %v814_v31 = vrot.slane %v809_v28, %v1283_v42 }
 0x1ae   : > { %v705_v44 = vmax.f32 %v675_v33, 0.0  ;;  %v677_v45 = vadd.f32 %v676_v40, %v571_v50  ;;  %v768_v57 = vmul.f32 %v736_v60, %v704_v38  ;;  %v780_v47 = vadd.f32 %v779_v43, %v767_v32 }
 0x1af   : > { %v697_v1 = vadd.f32 %v696_v59, %v591_v46  ;;  %v773_v50 = vmul.f32 %v751_v56, %v709_v54  ;;  %v713_v7 = vmax.f32 %v695_v49, 0.0  ;;  %v776_v15 = vmul.f32 %v756_v8, %v712_v5 }
 0x1b0   : > { %v769_v48 = vmul.f32 %v741_v4, %v705_v44  ;;  %v706_v52 = vmax.f32 %v677_v45, 0.0  ;;  %v793_v62 = vadd.f32 %v792_v55, %v768_v57  ;;  %v829_v43 = vunpack.c.l.s4 %v1077_v41 }
 0x1b1   : > { %v714_v13 = vmax.f32 %v697_v1, 0.0  ;;  %v777_v16 = vmul.f32 %v761_v14, %v713_v7 }
 0x1b2   : > { %v781_v63 = vadd.f32 %v780_v47, %v769_v48  ;;  %v770_v0 = vmul.f32 %v741_v4, %v706_v52  ;;  %v830_v46 = vunpack.c.0.s8 %v829_v43 }
 0x1b3   : > { %v778_v4 = vmul.f32 %v761_v14, %v714_v13 }
 0x1b4   : > { %v782_v6 = vadd.f32 %v781_v63, %v771_v51  ;;  %v794_v60 = vadd.f32 %v793_v62, %v770_v0  ;;  %v833_v58 = vsub.s32 %v830_v46, %v1277_v39 }
 0x1b6   : > { %v783_v11 = vadd.f32 %v782_v6, %v773_v50  ;;  %v795_v12 = vadd.f32 %v794_v60, %v772_v2 }
 0x1b8   : > { %v784_v17 = vadd.f32 %v783_v11, %v775_v10  ;;  %v796_v18 = vadd.f32 %v795_v12, %v774_v9 }
 0x1ba   : > { %v785_v19 = vadd.f32 %v784_v17, %v777_v16  ;;  %v797_v20 = vadd.f32 %v796_v18, %v776_v15 }
 0x1bc   : > { %v786_v53 = vrot.slane %v785_v19, 4  ;;  %v798_v21 = vadd.f32 %v797_v20, %v778_v4 }
 0x1be   : > { %v787_v22 = vadd.f32 %v786_v53, %v785_v19  ;;  %v799_v23 = vrot.slane %v798_v21, 4 }
 0x1c0   : > { %v788_v24 = vrot.slane %v787_v22, 2  ;;  %v800_v25 = vadd.f32 %v799_v23, %v798_v21 }
 0x1c2   : > { %v789_v26 = vadd.f32 %v788_v24, %v787_v22  ;;  %v801_v27 = vrot.slane %v800_v25, 2 }
 0x1c4   : > { %v790_v29 = vrot.slane %v789_v26, 1  ;;  %v802_v30 = vadd.f32 %v801_v27, %v800_v25 }
 0x1c6   : > { %v791_v32 = vadd.f32 %v790_v29, %v789_v26  ;;  %v803_v33 = vrot.slane %v802_v30, 1 }
 0x1c8   : > { %v815_v34 = vadd.f32 %v814_v31, %v791_v32  ;;  %v804_v35 = vadd.f32 %v803_v33, %v802_v30 }
 0x1ca   : > { %v817_v37 = vmul.f32 0.5, %v815_v34  ;;  %v816_v38 = vadd.f32 %v814_v31, %v804_v35 }
 0x1cc   : > { %1009 = vtanh.f32 %v817_v37  ;;  %v818_v40 = vmul.f32 0.5, %v816_v38 }
 0x1ce   : > { %1011 = vtanh.f32 %v818_v40 }
 0x1d9   : > { %v1010_v44 = vpop.eup %1009 }
 0x1da   : > { %v821_v45 = vadd.f32 1.0, %v1010_v44 }
 0x1db   : > { %v1012_v54 = vpop.eup %1011 }
 0x1dc   : > { %v822_v55 = vadd.f32 1.0, %v1012_v54  ;;  %v823_v42 = vmul.f32 0.5, %v821_v45 }
 0x1de   : > { %v824_v57 = vmul.f32 0.5, %v822_v55 }
 0x1e0   : > { %v827_v59 = vcombine.low %v823_v42, %v824_v57 }
 0x1e2   : > { %v834_v47 = vrot.slane %v827_v59, %v833_v58 }
 0x1e4   : > { %v841_v48 = vrot.slane %v834_v47, %v833_v58 }
 0x1e6   : > { %847 = vst.msk [vmem:[%s274_s19] sm:$0x3] %vm845_vm1, %v841_v48 }
 0x1e7   : > { %1026 = shalt.err (!%p1023_p3)
}
 0x1e8   : > { %s1027_s10 = scalar_lea.hbm %s861_s23, 32  ;;  %s1031_s16 = scalar_lea.hbm %s1397_s7, 64 }
 0x1e9   : > { %p1028_p4 = scmp.ne.s32.totalorder %s861_s23, %s1027_s10  ;;  %p1032_p9 = scmp.lt.s32.totalorder %s861_s23, %s1397_s7 }
 0x1ea   : > { %p1033_p10 = scmp.lt.s32.totalorder %s1031_s16, %s1027_s10 }
 0x1eb   : > { %p1029_p7 = pnand %p1028_p4, %p1160_p5 }
 0x1ec   : > { %p1034_p11 = por %p1033_p10, %p1032_p9 }
 0x1ed   : > { %p1030_p8 = pneg %p1029_p7 }
 0x1ef   : > { %p1035_p12 = pnand %p1034_p11, %p1030_p8 }
 0x1f1   : > { %1038 = shalt.err (!%p1035_p12)
}
 0x1f2   : > { %951 = dma.vmem_to_hbm [thread:$0]  (%p1160_p5), %s864_s20, 32, %s861_s23, %s849_s24  }
 0x1f3 PF: > { %p957_p13 = scmp.ge.s32.totalorder %s1073_s29, 2  ;;  %s875_s19 = sand.u32 1, %s1061_s26  }
 0x1f4   : > { %s876_s21 = scalar_lea.sflag [#allocation4], %s875_s19 }
 0x1f5   : > { %p954_p0 = pnand %p957_p13, %p1164_p6 }
 0x1f7   : > { %p955_p1 = pneg %p954_p0 }
 0x1f9   : > { %1056 = dma.done.wait (%p955_p1), %s876_s21, 32  }
 0x1fa   : > { %1058 = vsyncadd (%p955_p1), %s876_s21, 4294967264  ;;  %p19_p2 = scmp.ge.s32.totalorder %s1147_s8, 4   ;;  %s1400_s26 = smov %s1065_s27 }
 0x1fb   : > { %s1401_s27 = smov %s1069_s28  ;;  %s1402_s28 = smov %s1158_s11 }
 0x1fc   : > { %s1403_s29 = smov %s1147_s8  ;;  %21 = sbr.rel (!%p19_p2) target bundleno = 6 (0x6), region = 83 }
 0x201   :  { %881 = vsyncpa [#allocation4], 1 }
 0x202   :  { %883 = vsyncpa [#allocation4 + $0x1], 1 }

</bundles_post_ra>
